<compile_context>
chip_gen: v7x
topology: tpu7x:2x2x1
jax: 0.10.0
libtpu: 0.0.40
codegen_flags: <defaults>
</compile_context>

<pallas_src>
import functools

import jax
import jax.numpy as jnp
from jax import lax
from jax.experimental import pallas as pl
from jax.experimental.pallas import tpu as pltpu


# ----------------------------- Pallas kernel -------------------------------

def _matmul_bias_act_kernel(x_ref, w_ref, b_ref, o_ref, *, apply_relu):
    """Fused  o = act(x @ w + b)  on one (tm, K) x (K, Cp) tile pair."""
    acc = jnp.dot(x_ref[...], w_ref[...], preferred_element_type=jnp.float32)
    acc = acc + b_ref[...]                      # (tm, Cp) + (1, Cp) broadcast
    if apply_relu:
        acc = jnp.maximum(acc, 0.0)
    o_ref[...] = acc.astype(o_ref.dtype)


def matmul_bias_act(patches, w_kc, bias_1c, apply_relu, *, tm):
    """patches: (Mp, K) bf16, w_kc: (K, Cp) bf16, bias_1c: (1, Cp) f32.

    Mp must be a multiple of tm; K is consumed whole; Cp is a multiple of 128.
    """
    Mp, K = patches.shape
    Cp = w_kc.shape[1]
    kernel = functools.partial(_matmul_bias_act_kernel, apply_relu=apply_relu)
    cost = pl.CostEstimate(
        flops=2 * Mp * K * Cp,
        transcendentals=0,
        bytes_accessed=(Mp * K * patches.dtype.itemsize
                        + K * Cp * w_kc.dtype.itemsize
                        + Cp * 4
                        + Mp * Cp * 4),
    )
    return pl.pallas_call(
        kernel,
        out_shape=jax.ShapeDtypeStruct((Mp, Cp), jnp.float32),
        grid=(Mp // tm,),
        in_specs=[
            pl.BlockSpec((tm, K), lambda i: (i, 0)),   # row tile, pipelined
            pl.BlockSpec((K, Cp), lambda i: (0, 0)),   # weights, grid-invariant
            pl.BlockSpec((1, Cp), lambda i: (0, 0)),   # bias, grid-invariant
        ],
        out_specs=pl.BlockSpec((tm, Cp), lambda i: (i, 0)),
        compiler_params=pltpu.CompilerParams(
            dimension_semantics=("parallel",)),        # megacore split on v7x
        cost_estimate=cost,
    )(patches, w_kc, bias_1c)


# ------------------------------ JAX glue ------------------------------------

def _round_up(x, m):
    return (x + m - 1) // m * m


def _im2col_nhwc(x_nhwc, k=4, s=2, p=1):
    """Extract conv patches from NHWC input.

    Returns (N*Ho*Wo, k*k*C) with K ordered as (kh, kw, C)."""
    N, H, W, C = x_nhwc.shape
    xp = jnp.pad(x_nhwc, ((0, 0), (p, p), (p, p), (0, 0)))
    Ho = (H + 2 * p - k) // s + 1
    Wo = (W + 2 * p - k) // s + 1
    cols = []
    for kh in range(k):
        for kw in range(k):
            cols.append(xp[:, kh:kh + s * Ho:s, kw:kw + s * Wo:s, :])  # (N,Ho,Wo,C)
    stacked = jnp.stack(cols, axis=3)                    # (N, Ho, Wo, k*k, C)
    patches = stacked.reshape(N * Ho * Wo, k * k * C)    # K order = (kh, kw, C)
    return patches, (N, Ho, Wo)


def conv_layer_nhwc(x_nhwc, w_oihw, bias, apply_relu,
                    compute_dtype=jnp.bfloat16):
    """Conv2d(kernel=4, stride=2, padding=1) + optional ReLU on NHWC activations."""
    Cout, Cin, kh, kw = w_oihw.shape
    K = Cin * kh * kw

    # bf16 operands into the MXU; accumulation stays f32 inside the kernel.
    patches, (N, Ho, Wo) = _im2col_nhwc(
        x_nhwc.astype(compute_dtype), k=kh, s=2, p=1)

    # Weight flattened to match the (kh, kw, Cin) patch order.
    w_kc = (w_oihw.transpose(2, 3, 1, 0)                  # (kh, kw, Cin, Cout)
            .reshape(K, Cout).astype(compute_dtype))

    # Pad output channels to a lane-dense multiple of 128.
    Cp = _round_up(Cout, 128)
    w_kc = jnp.pad(w_kc, ((0, 0), (0, Cp - Cout)))
    b_1c = jnp.pad(bias.astype(jnp.float32), (0, Cp - Cout)).reshape(1, Cp)

    # Tile M: 512-row tiles at scale (fits v7x 64 MiB VMEM with K<=2048 in bf16,
    # double-buffered); shrink to a single 16-aligned tile for small problems.
    M = patches.shape[0]
    tm = 512 if M >= 512 else _round_up(M, 16)
    Mp = _round_up(M, tm)
    if Mp != M:
        patches = jnp.pad(patches, ((0, Mp - M), (0, 0)))

    out = matmul_bias_act(patches, w_kc, b_1c, apply_relu, tm=tm)   # (Mp, Cp) f32
    out = out[:M, :Cout].reshape(N, Ho, Wo, Cout)                   # stay NHWC
    return out


def discriminator_forward(x_nchw, params):
    h = jnp.transpose(x_nchw, (0, 2, 3, 1))               # NCHW -> NHWC once
    h = conv_layer_nhwc(h, params["w1"], params["b1"], apply_relu=True)
    h = conv_layer_nhwc(h, params["w2"], params["b2"], apply_relu=True)
    h = conv_layer_nhwc(h, params["w3"], params["b3"], apply_relu=False)
    return jnp.transpose(h, (0, 3, 1, 2))                 # NHWC -> NCHW once


# ------------------------- deterministic parameters -------------------------

def init_params(key):
    """PyTorch-style Conv2d default init (uniform +-1/sqrt(fan_in))."""
    shapes = {
        "w1": (64, 3, 4, 4),   "b1": (64,),
        "w2": (128, 64, 4, 4), "b2": (128,),
        "w3": (1, 128, 4, 4),  "b3": (1,),
    }
    params = {}
    keys = jax.random.split(key, len(shapes))
    for k_i, (name, shp) in zip(keys, shapes.items()):
        if name.startswith("w"):
            fan_in = shp[1] * shp[2] * shp[3]
        else:
            w_shp = shapes["w" + name[1:]]
            fan_in = w_shp[1] * w_shp[2] * w_shp[3]
        bound = 1.0 / jnp.sqrt(jnp.float32(fan_in))
        params[name] = jax.random.uniform(
            k_i, shp, dtype=jnp.float32, minval=-bound, maxval=bound)
    return params


# ------------------------------- references ----------------------------------

def _reference_forward(x, params, compute_dtype):
    """XLA conv reference. compute_dtype matches the kernel's MXU input dtype."""
    def conv(h, w, b, relu):
        y = lax.conv_general_dilated(
            h.astype(compute_dtype), w.astype(compute_dtype),
            window_strides=(2, 2), padding=((1, 1), (1, 1)),
            dimension_numbers=("NCHW", "OIHW", "NCHW"),
            preferred_element_type=jnp.float32)
        y = y + b.reshape(1, -1, 1, 1).astype(jnp.float32)
        return jnp.maximum(y, 0.0) if relu else y
    h = conv(x, params["w1"], params["b1"], True)
    h = conv(h, params["w2"], params["b2"], True)
    return conv(h, params["w3"], params["b3"], False)


# --------------------------------- main --------------------------------------

if __name__ == "__main__":
    key = jax.random.PRNGKey(0)
    k_param, k_x = jax.random.split(key)

    params = init_params(k_param)
    # Small input consistent with Conv2d(3, ...): N=2, C=3, H=W=16.
    x = jax.random.normal(k_x, (2, 3, 16, 16), dtype=jnp.float32)

    out = jax.block_until_ready(discriminator_forward(x, params))
    assert out.shape == (2, 1, 2, 2), out.shape

    # Tight check vs an identically-quantized (bf16 operand, f32 accum) reference.
    ref_bf16 = jax.block_until_ready(
        _reference_forward(x, params, compute_dtype=jnp.bfloat16))
    assert jnp.allclose(out, ref_bf16, rtol=1e-3, atol=1e-3), float(
        jnp.max(jnp.abs(out - ref_bf16)))

    # Loose sanity check vs the full-f32 reference (bounds bf16 quantization error).
    ref_f32 = jax.block_until_ready(
        _reference_forward(x, params, compute_dtype=jnp.float32))
    assert jnp.allclose(out, ref_f32, rtol=1e-1, atol=1e-1), float(
        jnp.max(jnp.abs(out - ref_f32)))

    print("KERNEL_OK")
</pallas_src>

<mosaic_0001>
module attributes {stable_mosaic.version = 11 : i64} {
  func.func @_matmul_bias_act_kernel(%arg0: i32, %arg1: memref<128x48xbf16, #tpu.memory_space<vmem>>, %arg2: memref<48x128xbf16, #tpu.memory_space<vmem>>, %arg3: memref<1x128xf32, #tpu.memory_space<vmem>>, %arg4: memref<128x128xf32, #tpu.memory_space<vmem>>) attributes {dimension_semantics = [#tpu.dimension_semantics<parallel>], iteration_bounds = array<i64: 1>, scalar_prefetch = 0 : i64, scratch_operands = 0 : i64, tpu.core_type = #tpu.core_type<tc>, window_params = [{transform_indices = @transform_0, window_bounds = array<i64: 128, 48>}, {pipeline_mode = #tpu.pipeline_mode<synchronous>, transform_indices = @transform_1, window_bounds = array<i64: 48, 128>}, {pipeline_mode = #tpu.pipeline_mode<synchronous>, transform_indices = @transform_2, window_bounds = array<i64: 1, 128>}, {transform_indices = @transform_3, window_bounds = array<i64: 128, 128>}]} {
    %c0 = arith.constant 0 : index
    %c0_0 = arith.constant 0 : index
    %0 = vector.load %arg1[%c0, %c0_0] : memref<128x48xbf16, #tpu.memory_space<vmem>>, vector<128x48xbf16>
    %c0_1 = arith.constant 0 : index
    %c0_2 = arith.constant 0 : index
    %1 = vector.load %arg2[%c0_1, %c0_2] : memref<48x128xbf16, #tpu.memory_space<vmem>>, vector<48x128xbf16>
    %cst = arith.constant dense<0.000000e+00> : vector<128x128xf32>
    %2 = tpu.matmul %0, %1, %cst {dimension_numbers = #tpu.dot_dimension_numbers<[1], [0], [0], [1], [0, 0, 1, 1], [], []>} : vector<128x48xbf16>, vector<48x128xbf16>, vector<128x128xf32> -> vector<128x128xf32>
    %c0_3 = arith.constant 0 : index
    %c0_4 = arith.constant 0 : index
    %3 = vector.load %arg3[%c0_3, %c0_4] : memref<1x128xf32, #tpu.memory_space<vmem>>, vector<1x128xf32>
    %4 = vector.broadcast %3 : vector<1x128xf32> to vector<128x128xf32>
    %5 = arith.addf %2, %4 : vector<128x128xf32>
    %cst_5 = arith.constant 0.000000e+00 : f32
    %6 = vector.broadcast %cst_5 : f32 to vector<128x128xf32>
    %7 = arith.maximumf %5, %6 : vector<128x128xf32>
    %c0_6 = arith.constant 0 : index
    %c0_7 = arith.constant 0 : index
    %8 = vector.load %arg4[%c0_6, %c0_7] : memref<128x128xf32, #tpu.memory_space<vmem>>, vector<128x128xf32>
    tpu.vector_store %arg4[%c0_6, %c0_7], %7 {strides = array<i32>} : memref<128x128xf32, #tpu.memory_space<vmem>>, vector<128x128xf32>,
    return
  }
  func.func @transform_0(%arg0: i32) -> (i32, i32) {
    %c0_i32 = arith.constant 0 : i32
    %c0_i32_0 = arith.constant 0 : i32
    return %arg0, %c0_i32 : i32, i32
  }
  func.func @transform_1(%arg0: i32) -> (i32, i32) {
    %c0_i32 = arith.constant 0 : i32
    %c0_i32_0 = arith.constant 0 : i32
    %c0_i32_1 = arith.constant 0 : i32
    return %c0_i32, %c0_i32_0 : i32, i32
  }
  func.func @transform_2(%arg0: i32) -> (i32, i32) {
    %c0_i32 = arith.constant 0 : i32
    %c0_i32_0 = arith.constant 0 : i32
    %c0_i32_1 = arith.constant 0 : i32
    return %c0_i32, %c0_i32_0 : i32, i32
  }
  func.func @transform_3(%arg0: i32) -> (i32, i32) {
    %c0_i32 = arith.constant 0 : i32
    %c0_i32_0 = arith.constant 0 : i32
    return %arg0, %c0_i32 : i32, i32
  }
}

</mosaic_0001>

<bundles_post_ra>
// kernel: tpu_custom_call.1
= control target key start
LH: loop header
LB: loop body
LE: loop exit
PB: predicated region body
PF: predicated region fallthrough
CT: control target
= control target key end

     0   :  { %vm103_vm0 = vcmask 392192   ;;  %s449_s0 = inlined_call_operand.vmem [shape: bf16[128,48], index: 0, kind: input, shape index: {}]   ;;  %s450_s1 = inlined_call_operand.vmem [shape: bf16[48,128], index: 1, kind: input, shape index: {}]   ;;  %s451_s2 = inlined_call_operand.vmem [shape: f32[1,128], index: 2, kind: input, shape index: {}]   ;;  %s452_s3 = inlined_call_operand.hbm [shape: f32[128,128], index: 3, kind: output, shape index: {}]  }
   0x1   :  { %v335_v0 = vld [vmem:[%s450_s1] sm:$0xff]   ;;  %v336_v1 = vld [vmem:[%s450_s1 + $0x8] sm:$0xff]   ;;  %v337_v2 = vld [vmem:[%s450_s1 + $0x10] sm:$0xff]  }
   0x2   :  { %304 = vmatprep.subr.bf16.mxu0 %v335_v0  ;;  %326 = vmatprep.subr.bf16.mxu1 %v335_v0  ;;  %v338_v3 = vld [vmem:[%s449_s0] sm:$0xff]   ;;  %v340_v5 = vld [vmem:[%s449_s0 + $0x8] sm:$0xff]   ;;  %v342_v7 = vld [vmem:[%s449_s0 + $0x10] sm:$0xff]  }
   0x3   :  { %305 = vmatpush3.bf16.msra.mxu0 %v335_v0  ;;  %329 = vmatpush3.bf16.msra.mxu1 %v335_v0  ;;  %v339_v4 = vld [vmem:[%s449_s0 + $0x20] sm:$0xff]   ;;  %v341_v6 = vld [vmem:[%s449_s0 + $0x28] sm:$0xff]   ;;  %v343_v8 = vld [vmem:[%s449_s0 + $0x30] sm:$0xff]  }
   0x4   :  { %306 = vmatprep.subr.bf16.mxu0 %v336_v1  ;;  %327 = vmatprep.subr.bf16.mxu1 %v336_v1 }
   0x5   :  { %310 = vmatprep.mubr.msk.bf16.mxu0 %vm103_vm0, %v338_v3  ;;  %318 = vmatprep.mubr.msk.bf16.mxu1 %vm103_vm0, %v339_v4 }
   0x7   :  { %307 = vmatpush3.bf16.msra.mxu0 %v336_v1  ;;  %330 = vmatpush3.bf16.msra.mxu1 %v336_v1 }
   0x8   :  { %308 = vmatprep.subr.bf16.mxu0 %v337_v2  ;;  %328 = vmatprep.subr.bf16.mxu1 %v337_v2 }
   0xb   :  { %309 = vmatpush3.bf16.msra.mxu0 %v337_v2  ;;  %331 = vmatpush3.bf16.msra.mxu1 %v337_v2 }
   0xc   :  { %8 = vsyncpa [#allocation3], 0  ;;  %v344_v9 = vld [vmem:[%s449_s0 + $0x18] sm:$0xff]   ;;  %v273_v11 = vld [vmem:[%s451_s2] ss:$0 sm:$0xff] }
   0xd   :  { %v345_v10 = vld [vmem:[%s449_s0 + $0x38] sm:$0xff]   ;;  %s370_s0 = smov [#allocation2]  }
   0xe   :  { %311 = vmatmul.mubr.msk.bf16.vlgmr.msra.gmra.mrb[0].mxu0 %vm103_vm0, %v340_v5  ;;  %319 = vmatmul.mubr.msk.bf16.vlgmr.msra.gmra.mrb[0].mxu1 %vm103_vm0, %v341_v6  ;;  %s262_s2 = sshll.u32 %s370_s0, 4  ;;  %s263_s2 = int_to_ptr.vmem [resolvable:$true] %s262_s2 }
   0xf   :  { %314 = vmatprep.mubr.msk.bf16.mxu0 %vm103_vm0, %v342_v7  ;;  %322 = vmatprep.mubr.msk.bf16.mxu1 %vm103_vm0, %v343_v8  ;;  %s346_s8 = scalar_lea.vmem %s263_s2, 2048  ;;  %p351_p1 = scmp.lt.s32.totalorder %s263_s2, %s263_s2 }
  0x10   :  { %p347_p0 = scmp.ne.s32.totalorder %s263_s2, %s346_s8  ;;  %p352_p2 = scmp.lt.s32.totalorder %s346_s8, %s346_s8 }
  0x12   :  { %p353_p3 = por %p352_p2, %p351_p1 }
  0x14   :  { %p354_p4 = pnand %p353_p3, %p347_p0 }
  0x16   :  { %315 = vmatmul.mubr.msk.bf16.gmra.mrb[4].mxu0 %vm103_vm0, %v344_v9  ;;  %323 = vmatmul.mubr.msk.bf16.gmra.mrb[4].mxu1 %vm103_vm0, %v345_v10 }
  0xe1   :  { %v312_v12 = vpop.f32.mrb[0].mxu0  ;;  %v320_v13 = vpop.f32.mrb[0].mxu1 }
  0xe2   :  { %v171_v14 = vadd.f32 %v312_v12, %v273_v11  ;;  %v203_v15 = vadd.f32 %v320_v13, %v273_v11  ;;  %v162_v16 = vpop.f32.mrb[1].mxu0  ;;  %v194_v17 = vpop.f32.mrb[1].mxu1 }
  0xe3   :  { %v163_v18 = vadd.f32 %v273_v11, %v162_v16  ;;  %v195_v19 = vadd.f32 %v273_v11, %v194_v17  ;;  %v313_v20 = vpop.f32.mrb[2].mxu0  ;;  %v321_v21 = vpop.f32.mrb[2].mxu1 }
  0xe4   :  { %v227_v22 = vmax.f32 %v171_v14, 0.0  ;;  %v235_v23 = vmax.f32 %v203_v15, 0.0  ;;  %v174_v24 = vadd.f32 %v313_v20, %v273_v11  ;;  %v206_v25 = vadd.f32 %v321_v21, %v273_v11  ;;  %v165_v26 = vpop.f32.mrb[3].mxu0  ;;  %v197_v27 = vpop.f32.mrb[3].mxu1 }
  0xe5   :  { %v225_v28 = vmax.f32 %v163_v18, 0.0  ;;  %v233_v29 = vmax.f32 %v195_v19, 0.0  ;;  %v166_v30 = vadd.f32 %v273_v11, %v165_v26  ;;  %v198_v31 = vadd.f32 %v273_v11, %v197_v27 }
  0xe6   :  { %243 = vst [vmem:[#allocation2 + $0x10] sm:$0xff] %v227_v22  ;;  %251 = vst [vmem:[#allocation2 + $0x50] sm:$0xff] %v235_v23  ;;  %v228_v32 = vmax.f32 %v174_v24, 0.0  ;;  %v236_v33 = vmax.f32 %v206_v25, 0.0 }
  0xe7   :  { %241 = vst [vmem:[#allocation2] sm:$0xff] %v225_v28  ;;  %249 = vst [vmem:[#allocation2 + $0x40] sm:$0xff] %v233_v29  ;;  %v226_v34 = vmax.f32 %v166_v30, 0.0  ;;  %v234_v35 = vmax.f32 %v198_v31, 0.0 }
  0xe8   :  { %244 = vst [vmem:[#allocation2 + $0x18] sm:$0xff] %v228_v32  ;;  %252 = vst [vmem:[#allocation2 + $0x58] sm:$0xff] %v236_v33 }
  0xe9   :  { %242 = vst [vmem:[#allocation2 + $0x8] sm:$0xff] %v226_v34  ;;  %250 = vst [vmem:[#allocation2 + $0x48] sm:$0xff] %v234_v35  ;;  %v316_v36 = vpop.f32.mrb[4].mxu0  ;;  %v324_v37 = vpop.f32.mrb[4].mxu1 }
  0xea   :  { %v187_v38 = vadd.f32 %v316_v36, %v273_v11  ;;  %v219_v39 = vadd.f32 %v324_v37, %v273_v11  ;;  %v178_v40 = vpop.f32.mrb[5].mxu0  ;;  %v210_v41 = vpop.f32.mrb[5].mxu1 }
  0xeb   :  { %v179_v42 = vadd.f32 %v273_v11, %v178_v40  ;;  %v211_v43 = vadd.f32 %v273_v11, %v210_v41  ;;  %v317_v44 = vpop.f32.mrb[6].mxu0  ;;  %v325_v45 = vpop.f32.mrb[6].mxu1 }
  0xec   :  { %v231_v46 = vmax.f32 %v187_v38, 0.0  ;;  %v239_v47 = vmax.f32 %v219_v39, 0.0  ;;  %v190_v48 = vadd.f32 %v317_v44, %v273_v11  ;;  %v222_v49 = vadd.f32 %v325_v45, %v273_v11  ;;  %v181_v50 = vpop.f32.mrb[7].mxu0  ;;  %v213_v51 = vpop.f32.mrb[7].mxu1 }
  0xed   :  { %v229_v52 = vmax.f32 %v179_v42, 0.0  ;;  %v237_v53 = vmax.f32 %v211_v43, 0.0  ;;  %v182_v54 = vadd.f32 %v273_v11, %v181_v50  ;;  %v214_v55 = vadd.f32 %v273_v11, %v213_v51 }
  0xee   :  { %247 = vst [vmem:[#allocation2 + $0x30] sm:$0xff] %v231_v46  ;;  %255 = vst [vmem:[#allocation2 + $0x70] sm:$0xff] %v239_v47  ;;  %v232_v56 = vmax.f32 %v190_v48, 0.0  ;;  %v240_v57 = vmax.f32 %v222_v49, 0.0 }
  0xef   :  { %245 = vst [vmem:[#allocation2 + $0x20] sm:$0xff] %v229_v52  ;;  %253 = vst [vmem:[#allocation2 + $0x60] sm:$0xff] %v237_v53  ;;  %v230_v58 = vmax.f32 %v182_v54, 0.0  ;;  %v238_v59 = vmax.f32 %v214_v55, 0.0 }
  0xf0   :  { %248 = vst [vmem:[#allocation2 + $0x38] sm:$0xff] %v232_v56  ;;  %256 = vst [vmem:[#allocation2 + $0x78] sm:$0xff] %v240_v57 }
  0xf1   :  { %246 = vst [vmem:[#allocation2 + $0x28] sm:$0xff] %v230_v58  ;;  %254 = vst [vmem:[#allocation2 + $0x68] sm:$0xff] %v238_v59 }
  0xf2   :  { %357 = shalt.err (!%p354_p4)
}
  0xf3   :  { %s358_s11 = scalar_lea.hbm %s452_s3, 2048 }
  0xf4   :  { %p359_p5 = scmp.ne.s32.totalorder %s452_s3, %s358_s11  ;;  %p362_p6 = scmp.lt.u32.totalorder %s358_s11, %s452_s3 }
  0xf6   :  { %p364_p7 = pnand %p362_p6, %p359_p5 }
  0xf8   :  { %367 = shalt.err (!%p364_p7)
}
  0xf9   :  { %s371_s16 = smov 128   ;;  %s372_s17 = smov 8  }
  0xfa   :  { %268 = dma.vmem_to_hbm [thread:$0]  %s263_s2, 2048, %s452_s3, [#allocation3], %s371_s16, %s371_s16, %s372_s17  }
  0xfb   :  { %368 = dma.done.wait [#allocation3], 2048  }
  0xfc   :  { %369 = vsyncadd [#allocation3], 4294965248 }
  0xfd   :  { %272 = vsyncpa [#allocation3], 1 }

</bundles_post_ra>
